<compile_context>
chip_gen: v7x
topology: tpu7x:2x2x1
jax: 0.10.0
libtpu: 0.0.40
codegen_flags: <defaults>
</compile_context>

<pallas_src>
import jax
import jax.numpy as jnp
from jax.experimental import pallas as pl
from jax.experimental.pallas import tpu as pltpu

LANE = 128
SUBLANE = 16  # bf16 sublane packing: keep batch tiles a multiple of 16


def _round_up(n, m):
    return ((n + m - 1) // m) * m


def _dqn_kernel(x_ref, w1_ref, b1_ref, w2_ref, b2_ref, w3_ref, b3_ref, o_ref):
    # One batch tile per grid step.  Weights/biases have constant block indices, so
    # they stay VMEM-resident across all batch tiles.  bf16 operands, f32 accumulate.
    x = x_ref[...]  # already bf16 (cast in the wrapper)

    h1 = jnp.dot(x, w1_ref[...], preferred_element_type=jnp.float32) + b1_ref[...]
    h1 = jnp.maximum(h1, 0.0).astype(jnp.bfloat16)

    h2 = jnp.dot(h1, w2_ref[...], preferred_element_type=jnp.float32) + b2_ref[...]
    h2 = jnp.maximum(h2, 0.0).astype(jnp.bfloat16)

    out = jnp.dot(h2, w3_ref[...], preferred_element_type=jnp.float32) + b3_ref[...]
    o_ref[...] = out.astype(o_ref.dtype)  # lane-dense bf16 store (half the HBM write)


def dqn_forward(x, params, out_dim, *, tile_b=1024, min_rows_to_split=256, trim=True):
    """x: (B, input_dim).  params from init_params: bf16 weights (in, out), f32 biases
    (1, out); the last layer is zero-padded to a lane-dense width.

    tile_b=1024 fits every generation's scoped-VMEM default (v5e's 16 MiB is the
    binding one); on v6e/v7x training batches tile_b=2048 is also safe and halves grid
    overhead.  trim=False returns the (padded_B, padded_N) bf16 buffer so the consumer
    can slice lazily instead of paying an extra XLA slice copy.
    """
    w1, b1 = params["w1"], params["b1"]
    w2, b2 = params["w2"], params["b2"]
    w3, b3 = params["w3"], params["b3"]

    B, in_dim = x.shape
    h1_dim = w1.shape[1]
    h2_dim = w2.shape[1]
    n_pad = w3.shape[1]  # lane-dense (multiple of 128) padded output width

    # Balanced batch tiling: choose step count, then tile size, so padding <= 15 rows.
    # Force >=2 (even) steps when the batch is big enough so both v7x TCs get work.
    steps = pl.cdiv(B, min(tile_b, _round_up(B, SUBLANE)))
    if B >= min_rows_to_split:
        steps = max(steps, 2)
    if steps > 1 and steps % 2:
        steps += 1
    tb = _round_up(pl.cdiv(B, steps), SUBLANE)
    b_pad = steps * tb

    xb = x.astype(jnp.bfloat16)  # bf16 input: halves the streamed x DMA bytes
    if b_pad != B:
        xb = jnp.pad(xb, ((0, b_pad - B), (0, 0)))

    flops = 2 * b_pad * (in_dim * h1_dim + h1_dim * h2_dim + h2_dim * n_pad)
    bytes_accessed = (
        b_pad * in_dim * 2                       # x (bf16)
        + (w1.size + w2.size + w3.size) * 2      # weights (bf16)
        + (b1.size + b2.size + b3.size) * 4      # biases (f32)
        + b_pad * n_pad * 2                      # output (bf16)
    )

    out = pl.pallas_call(
        _dqn_kernel,
        out_shape=jax.ShapeDtypeStruct((b_pad, n_pad), jnp.bfloat16),
        grid=(steps,),
        in_specs=[
            pl.BlockSpec((tb, in_dim), lambda i: (i, 0)),      # x streams over batch
            pl.BlockSpec((in_dim, h1_dim), lambda i: (0, 0)),  # weights: constant block
            pl.BlockSpec((1, h1_dim), lambda i: (0, 0)),
            pl.BlockSpec((h1_dim, h2_dim), lambda i: (0, 0)),
            pl.BlockSpec((1, h2_dim), lambda i: (0, 0)),
            pl.BlockSpec((h2_dim, n_pad), lambda i: (0, 0)),
            pl.BlockSpec((1, n_pad), lambda i: (0, 0)),
        ],
        out_specs=pl.BlockSpec((tb, n_pad), lambda i: (i, 0)),  # lane-dense bf16 out
        compiler_params=pltpu.CompilerParams(
            dimension_semantics=("parallel",),  # shard batch tiles across TCs (v7x)
        ),
        cost_estimate=pl.CostEstimate(
            flops=flops, transcendentals=0, bytes_accessed=bytes_accessed),
    )(xb, w1, b1, w2, b2, w3, b3)

    if trim:
        out = out[:B, :out_dim]
    return out


def init_params(key, input_dim, output_dim):
    """Deterministic synthetic parameters matching nn.Linear shapes (stored transposed)."""
    ks = jax.random.split(key, 6)
    n_pad = _round_up(max(output_dim, LANE), LANE)

    def linear(kw, kb, fan_in, fan_out):
        # torch-default-like init: U(-1/sqrt(fan_in), 1/sqrt(fan_in))
        bound = 1.0 / jnp.sqrt(jnp.float32(fan_in))
        w = jax.random.uniform(kw, (fan_in, fan_out), jnp.float32, -bound, bound)
        b = jax.random.uniform(kb, (1, fan_out), jnp.float32, -bound, bound)
        return w, b

    w1, b1 = linear(ks[0], ks[1], input_dim, 512)
    w2, b2 = linear(ks[2], ks[3], 512, 256)
    w3, b3 = linear(ks[4], ks[5], 256, output_dim)

    # Zero-pad the final layer to a lane-dense output width (sliced off in the wrapper).
    w3 = jnp.pad(w3, ((0, 0), (0, n_pad - output_dim)))
    b3 = jnp.pad(b3, ((0, 0), (0, n_pad - output_dim)))

    # bf16 weights (MXU-native, half the HBM bytes); f32 biases (added post-accumulate).
    return {
        "w1": w1.astype(jnp.bfloat16), "b1": b1,
        "w2": w2.astype(jnp.bfloat16), "b2": b2,
        "w3": w3.astype(jnp.bfloat16), "b3": b3,
    }


def dqn_reference(x, p, out_dim):
    """Pure-JAX reference with the same bf16-operand / f32-accumulate / bf16-store numerics."""
    xb = x.astype(jnp.bfloat16)
    h1 = jnp.dot(xb, p["w1"], preferred_element_type=jnp.float32) + p["b1"]
    h1 = jnp.maximum(h1, 0.0).astype(jnp.bfloat16)
    h2 = jnp.dot(h1, p["w2"], preferred_element_type=jnp.float32) + p["b2"]
    h2 = jnp.maximum(h2, 0.0).astype(jnp.bfloat16)
    out = jnp.dot(h2, p["w3"], preferred_element_type=jnp.float32) + p["b3"]
    return out.astype(jnp.bfloat16).astype(jnp.float32)[:, :out_dim]


if __name__ == "__main__":
    key = jax.random.PRNGKey(0)
    k_params, k1, k2, k3 = jax.random.split(key, 4)

    input_dim = 32   # state feature vector size
    output_dim = 8   # number of actions
    params = init_params(k_params, input_dim, output_dim)

    def check(x, **kw):
        out = jax.block_until_ready(dqn_forward(x, params, output_dim, **kw))
        ref = dqn_reference(x, params, output_dim)
        assert out.shape == (x.shape[0], output_dim), out.shape
        assert jnp.allclose(out.astype(jnp.float32), ref, atol=2e-2, rtol=2e-2), "mismatch"

    # Acting path: tiny batch, single grid step (block == full padded array).
    check(jax.random.normal(k1, (8, input_dim), jnp.float32))

    # Small training batch: forced to 2 balanced 160-row tiles (both v7x TCs busy).
    check(jax.random.normal(k2, (300, input_dim), jnp.float32))

    # Multi-tile pipeline: 4 balanced 160-row tiles, zero padded rows.
    check(jax.random.normal(k3, (640, input_dim), jnp.float32), tile_b=160)

    print("KERNEL_OK")
</pallas_src>

<mosaic_0001>
module attributes {stable_mosaic.version = 11 : i64} {
  func.func @_dqn_kernel(%arg0: i32, %arg1: memref<16x32xbf16, #tpu.memory_space<vmem>>, %arg2: memref<32x512xbf16, #tpu.memory_space<vmem>>, %arg3: memref<1x512xf32, #tpu.memory_space<vmem>>, %arg4: memref<512x256xbf16, #tpu.memory_space<vmem>>, %arg5: memref<1x256xf32, #tpu.memory_space<vmem>>, %arg6: memref<256x128xbf16, #tpu.memory_space<vmem>>, %arg7: memref<1x128xf32, #tpu.memory_space<vmem>>, %arg8: memref<16x128xbf16, #tpu.memory_space<vmem>>) attributes {dimension_semantics = [#tpu.dimension_semantics<parallel>], iteration_bounds = array<i64: 1>, scalar_prefetch = 0 : i64, scratch_operands = 0 : i64, tpu.core_type = #tpu.core_type<tc>, window_params = [{transform_indices = @transform_0, window_bounds = array<i64: 16, 32>}, {pipeline_mode = #tpu.pipeline_mode<synchronous>, transform_indices = @transform_1, window_bounds = array<i64: 32, 512>}, {pipeline_mode = #tpu.pipeline_mode<synchronous>, transform_indices = @transform_2, window_bounds = array<i64: 1, 512>}, {pipeline_mode = #tpu.pipeline_mode<synchronous>, transform_indices = @transform_3, window_bounds = array<i64: 512, 256>}, {pipeline_mode = #tpu.pipeline_mode<synchronous>, transform_indices = @transform_4, window_bounds = array<i64: 1, 256>}, {pipeline_mode = #tpu.pipeline_mode<synchronous>, transform_indices = @transform_5, window_bounds = array<i64: 256, 128>}, {pipeline_mode = #tpu.pipeline_mode<synchronous>, transform_indices = @transform_6, window_bounds = array<i64: 1, 128>}, {transform_indices = @transform_7, window_bounds = array<i64: 16, 128>}]} {
    %c0 = arith.constant 0 : index
    %c0_0 = arith.constant 0 : index
    %0 = vector.load %arg1[%c0, %c0_0] : memref<16x32xbf16, #tpu.memory_space<vmem>>, vector<16x32xbf16>
    %c0_1 = arith.constant 0 : index
    %c0_2 = arith.constant 0 : index
    %1 = vector.load %arg2[%c0_1, %c0_2] : memref<32x512xbf16, #tpu.memory_space<vmem>>, vector<32x512xbf16>
    %cst = arith.constant dense<0.000000e+00> : vector<16x512xf32>
    %2 = tpu.matmul %0, %1, %cst {dimension_numbers = #tpu.dot_dimension_numbers<[1], [0], [0], [1], [0, 0, 1, 1], [], []>} : vector<16x32xbf16>, vector<32x512xbf16>, vector<16x512xf32> -> vector<16x512xf32>
    %c0_3 = arith.constant 0 : index
    %c0_4 = arith.constant 0 : index
    %3 = vector.load %arg3[%c0_3, %c0_4] : memref<1x512xf32, #tpu.memory_space<vmem>>, vector<1x512xf32>
    %4 = vector.broadcast %3 : vector<1x512xf32> to vector<16x512xf32>
    %5 = arith.addf %2, %4 : vector<16x512xf32>
    %cst_5 = arith.constant 0.000000e+00 : f32
    %6 = vector.broadcast %cst_5 : f32 to vector<16x512xf32>
    %7 = arith.maximumf %5, %6 : vector<16x512xf32>
    %8 = arith.truncf %7 : vector<16x512xf32> to vector<16x512xbf16>
    %c0_6 = arith.constant 0 : index
    %c0_7 = arith.constant 0 : index
    %9 = vector.load %arg4[%c0_6, %c0_7] : memref<512x256xbf16, #tpu.memory_space<vmem>>, vector<512x256xbf16>
    %cst_8 = arith.constant dense<0.000000e+00> : vector<16x256xf32>
    %10 = tpu.matmul %8, %9, %cst_8 {dimension_numbers = #tpu.dot_dimension_numbers<[1], [0], [0], [1], [0, 0, 1, 1], [], []>} : vector<16x512xbf16>, vector<512x256xbf16>, vector<16x256xf32> -> vector<16x256xf32>
    %c0_9 = arith.constant 0 : index
    %c0_10 = arith.constant 0 : index
    %11 = vector.load %arg5[%c0_9, %c0_10] : memref<1x256xf32, #tpu.memory_space<vmem>>, vector<1x256xf32>
    %12 = vector.broadcast %11 : vector<1x256xf32> to vector<16x256xf32>
    %13 = arith.addf %10, %12 : vector<16x256xf32>
    %cst_11 = arith.constant 0.000000e+00 : f32
    %14 = vector.broadcast %cst_11 : f32 to vector<16x256xf32>
    %15 = arith.maximumf %13, %14 : vector<16x256xf32>
    %16 = arith.truncf %15 : vector<16x256xf32> to vector<16x256xbf16>
    %c0_12 = arith.constant 0 : index
    %c0_13 = arith.constant 0 : index
    %17 = vector.load %arg6[%c0_12, %c0_13] : memref<256x128xbf16, #tpu.memory_space<vmem>>, vector<256x128xbf16>
    %cst_14 = arith.constant dense<0.000000e+00> : vector<16x128xf32>
    %18 = tpu.matmul %16, %17, %cst_14 {dimension_numbers = #tpu.dot_dimension_numbers<[1], [0], [0], [1], [0, 0, 1, 1], [], []>} : vector<16x256xbf16>, vector<256x128xbf16>, vector<16x128xf32> -> vector<16x128xf32>
    %c0_15 = arith.constant 0 : index
    %c0_16 = arith.constant 0 : index
    %19 = vector.load %arg7[%c0_15, %c0_16] : memref<1x128xf32, #tpu.memory_space<vmem>>, vector<1x128xf32>
    %20 = vector.broadcast %19 : vector<1x128xf32> to vector<16x128xf32>
    %21 = arith.addf %18, %20 : vector<16x128xf32>
    %22 = arith.truncf %21 : vector<16x128xf32> to vector<16x128xbf16>
    %c0_17 = arith.constant 0 : index
    %c0_18 = arith.constant 0 : index
    %23 = vector.load %arg8[%c0_17, %c0_18] : memref<16x128xbf16, #tpu.memory_space<vmem>>, vector<16x128xbf16>
    tpu.vector_store %arg8[%c0_17, %c0_18], %22 {strides = array<i32>} : memref<16x128xbf16, #tpu.memory_space<vmem>>, vector<16x128xbf16>,
    return
  }
  func.func @transform_0(%arg0: i32) -> (i32, i32) {
    %c0_i32 = arith.constant 0 : i32
    %c0_i32_0 = arith.constant 0 : i32
    return %arg0, %c0_i32 : i32, i32
  }
  func.func @transform_1(%arg0: i32) -> (i32, i32) {
    %c0_i32 = arith.constant 0 : i32
    %c0_i32_0 = arith.constant 0 : i32
    %c0_i32_1 = arith.constant 0 : i32
    return %c0_i32, %c0_i32_0 : i32, i32
  }
  func.func @transform_2(%arg0: i32) -> (i32, i32) {
    %c0_i32 = arith.constant 0 : i32
    %c0_i32_0 = arith.constant 0 : i32
    %c0_i32_1 = arith.constant 0 : i32
    return %c0_i32, %c0_i32_0 : i32, i32
  }
  func.func @transform_3(%arg0: i32) -> (i32, i32) {
    %c0_i32 = arith.constant 0 : i32
    %c0_i32_0 = arith.constant 0 : i32
    %c0_i32_1 = arith.constant 0 : i32
    return %c0_i32, %c0_i32_0 : i32, i32
  }
  func.func @transform_4(%arg0: i32) -> (i32, i32) {
    %c0_i32 = arith.constant 0 : i32
    %c0_i32_0 = arith.constant 0 : i32
    %c0_i32_1 = arith.constant 0 : i32
    return %c0_i32, %c0_i32_0 : i32, i32
  }
  func.func @transform_5(%arg0: i32) -> (i32, i32) {
    %c0_i32 = arith.constant 0 : i32
    %c0_i32_0 = arith.constant 0 : i32
    %c0_i32_1 = arith.constant 0 : i32
    return %c0_i32, %c0_i32_0 : i32, i32
  }
  func.func @transform_6(%arg0: i32) -> (i32, i32) {
    %c0_i32 = arith.constant 0 : i32
    %c0_i32_0 = arith.constant 0 : i32
    %c0_i32_1 = arith.constant 0 : i32
    return %c0_i32, %c0_i32_0 : i32, i32
  }
  func.func @transform_7(%arg0: i32) -> (i32, i32) {
    %c0_i32 = arith.constant 0 : i32
    %c0_i32_0 = arith.constant 0 : i32
    return %arg0, %c0_i32 : i32, i32
  }
}

</mosaic_0001>

<bundles_post_ra>
// kernel: tpu_custom_call.1
= control target key start
LH: loop header
LB: loop body
LE: loop exit
PB: predicated region body
PF: predicated region fallthrough
CT: control target
= control target key end

     0   :  { %12 = vsyncpa [#allocation3], 0  ;;  %s1487_s0 = inlined_call_operand.hbm [shape: bf16[16,32], index: 0, kind: input, shape index: {}]   ;;  %s1488_s1 = inlined_call_operand.hbm [shape: bf16[32,512], index: 1, kind: input, shape index: {}]   ;;  %s1489_s2 = inlined_call_operand.vmem [shape: f32[1,512], index: 2, kind: input, shape index: {}]   ;;  %s1490_s3 = inlined_call_operand.hbm [shape: bf16[512,256], index: 3, kind: input, shape index: {}]   ;;  %s1491_s4 = inlined_call_operand.vmem [shape: f32[1,256], index: 4, kind: input, shape index: {}]   ;;  %s1492_s5 = inlined_call_operand.hbm [shape: bf16[256,128], index: 5, kind: input, shape index: {}]   ;;  %s1493_s6 = inlined_call_operand.vmem [shape: f32[1,128], index: 6, kind: input, shape index: {}]   ;;  %s1494_s7 = inlined_call_operand.hbm [shape: bf16[16,128], index: 7, kind: output, shape index: {}]  }
   0x1   :  { %13 = vsyncpa [#allocation6], 0 }
   0x2   :  { %14 = vsyncpa [#allocation9], 0 }
   0x3   :  { %15 = vsyncpa [#allocation4], 0  ;;  %s1341_s24 = smov [#allocation5]   ;;  %s1223_s28 = scalar_lea.hbm %s1488_s1, 1024 }
   0x4   :  { %s33_s25 = sshll.u32 %s1341_s24, 4  ;;  %p1224_p0 = scmp.ne.s32.totalorder %s1488_s1, %s1223_s28  ;;  %s34_s25 = int_to_ptr.vmem [resolvable:$true] %s33_s25 }
   0x5   :  { %p1227_p1 = scmp.lt.u32.totalorder %s1223_s28, %s1488_s1 }
   0x7   :  { %p1229_p2 = pnand %p1227_p1, %p1224_p0 }
   0x9   :  { %1232 = shalt.err (!%p1229_p2)
}
   0xa   :  { %s1233_s10 = scalar_lea.vmem %s34_s25, 1024  ;;  %p1238_p4 = scmp.lt.s32.totalorder %s34_s25, %s34_s25 }
   0xb   :  { %p1234_p3 = scmp.ne.s32.totalorder %s34_s25, %s1233_s10  ;;  %p1239_p5 = scmp.lt.s32.totalorder %s1233_s10, %s1233_s10 }
   0xd   :  { %p1240_p6 = por %p1239_p5, %p1238_p4 }
   0xf   :  { %p1241_p7 = pnand %p1240_p6, %p1234_p3 }
  0x11   :  { %1244 = shalt.err (!%p1241_p7)
}
  0x12   :  { %s1342_s11 = smov 256   ;;  %s1343_s12 = smov 16  }
  0x13   :  { %39 = dma.hbm_to_vmem [thread:$0]  %s1488_s1, 1024, %s34_s25, [#allocation6], %s1342_s11, %s1342_s11, %s1343_s12  }
  0x14   :  { %s1344_s15 = smov [#allocation2]   ;;  %s1245_s19 = scalar_lea.hbm %s1487_s0, 128 }
  0x15   :  { %s21_s16 = sshll.u32 %s1344_s15, 4  ;;  %p1246_p8 = scmp.ne.s32.totalorder %s1487_s0, %s1245_s19  ;;  %s22_s16 = int_to_ptr.vmem [resolvable:$true] %s21_s16 }
  0x16   :  { %p1249_p9 = scmp.lt.u32.totalorder %s1245_s19, %s1487_s0 }
  0x18   :  { %p1251_p10 = pnand %p1249_p9, %p1246_p8 }
  0x1a   :  { %1254 = shalt.err (!%p1251_p10)
}
  0x1b   :  { %s1255_s24 = scalar_lea.vmem %s22_s16, 128  ;;  %p1260_p12 = scmp.lt.s32.totalorder %s22_s16, %s22_s16 }
  0x1c   :  { %p1256_p11 = scmp.ne.s32.totalorder %s22_s16, %s1255_s24  ;;  %p1261_p13 = scmp.lt.s32.totalorder %s1255_s24, %s1255_s24 }
  0x1e   :  { %p1262_p0 = por %p1261_p13, %p1260_p12 }
  0x20   :  { %p1263_p1 = pnand %p1262_p0, %p1256_p11 }
  0x22   :  { %1266 = shalt.err (!%p1263_p1)
}
  0x23   :  { %s1345_s1 = smov 64   ;;  %s1346_s25 = smov 4  }
  0x24   :  { %27 = dma.hbm_to_vmem [thread:$0]  %s1487_s0, 128, %s22_s16, [#allocation3], %s1345_s1, %s1345_s1, %s1346_s25  }
  0x25   :  { %s1347_s28 = smov [#allocation7]   ;;  %s1267_s9 = scalar_lea.hbm %s1490_s3, 8192 }
  0x26   :  { %s47_s29 = sshll.u32 %s1347_s28, 4  ;;  %p1268_p2 = scmp.ne.s32.totalorder %s1490_s3, %s1267_s9  ;;  %s48_s29 = int_to_ptr.vmem [resolvable:$true] %s47_s29 }
  0x27   :  { %p1271_p3 = scmp.lt.u32.totalorder %s1267_s9, %s1490_s3 }
  0x29   :  { %p1273_p4 = pnand %p1271_p3, %p1268_p2 }
  0x2b   :  { %1276 = shalt.err (!%p1273_p4)
}
  0x2c   :  { %s1277_s14 = scalar_lea.vmem %s48_s29, 8192  ;;  %p1282_p6 = scmp.lt.s32.totalorder %s48_s29, %s48_s29 }
  0x2d   :  { %p1278_p5 = scmp.ne.s32.totalorder %s48_s29, %s1277_s14  ;;  %p1283_p7 = scmp.lt.s32.totalorder %s1277_s14, %s1277_s14 }
  0x2f   :  { %p1284_p8 = por %p1283_p7, %p1282_p6 }
  0x31   :  { %p1285_p9 = pnand %p1284_p8, %p1278_p5 }
  0x33   :  { %1288 = shalt.err (!%p1285_p9)
}
  0x34   :  { %s1348_s0 = smov 128   ;;  %s1349_s15 = smov 8  }
  0x35   :  { %53 = dma.hbm_to_vmem [thread:$0]  %s1490_s3, 8192, %s48_s29, [#allocation6], %s1348_s0, %s1348_s0, %s1349_s15  }
  0x36   :  { %s1350_s18 = smov [#allocation8]   ;;  %s1289_s22 = scalar_lea.hbm %s1492_s5, 2048 }
  0x37   :  { %s61_s19 = sshll.u32 %s1350_s18, 4  ;;  %p1290_p10 = scmp.ne.s32.totalorder %s1492_s5, %s1289_s22  ;;  %s62_s19 = int_to_ptr.vmem [resolvable:$true] %s61_s19 }
  0x38   :  { %p1293_p11 = scmp.lt.u32.totalorder %s1289_s22, %s1492_s5 }
  0x3a   :  { %p1295_p12 = pnand %p1293_p11, %p1290_p10 }
  0x3c   :  { %1298 = shalt.err (!%p1295_p12)
}
  0x3d   :  { %s1299_s28 = scalar_lea.vmem %s62_s19, 2048  ;;  %p1304_p0 = scmp.lt.s32.totalorder %s62_s19, %s62_s19 }
  0x3e   :  { %p1300_p13 = scmp.ne.s32.totalorder %s62_s19, %s1299_s28  ;;  %p1305_p1 = scmp.lt.s32.totalorder %s1299_s28, %s1299_s28 }
  0x40   :  { %p1306_p2 = por %p1305_p1, %p1304_p0 }
  0x42   :  { %p1307_p3 = pnand %p1306_p2, %p1300_p13 }
  0x44   :  { %1310 = shalt.err (!%p1307_p3)
}
  0x45   :  { %67 = dma.hbm_to_vmem [thread:$0]  %s1492_s5, 2048, %s62_s19, [#allocation9], %s1345_s1, %s1345_s1, %s1346_s25  }
  0x46   :  { %1333 = dma.done.wait [#allocation3], 128  }
  0x47   :  { %1334 = vsyncadd [#allocation3], 4294967168 }
  0x48   :  { %1335 = dma.done.wait [#allocation6], 9216  }
  0x49   :  { %1336 = vsyncadd [#allocation6], 4294958080 }
  0x4a   :  { %1337 = dma.done.wait [#allocation9], 2048  }
  0x4b   :  { %1338 = vsyncadd [#allocation9], 4294965248  ;;  %v1351_v0 = vmov 0   ;;  %v1098_v1 = vld [vmem:[#allocation5 + $0x4] ss:$16 sps:$4 sm:$0xff]   ;;  %v1104_v6 = vld [vmem:[#allocation2] sm:$0xff]  }
  0x4c   :  { %196 = vmatprep.mubr.bf16.mxu0 %v1351_v0  ;;  %v1100_v2 = vld [vmem:[#allocation5] ss:$16 sps:$4 sm:$0xff]   ;;  %164 = vmatprep.subr.bf16.mxu0 %v1098_v1  ;;  %v1101_v3 = vld [vmem:[#allocation5 + $0x24] ss:$16 sps:$4 sm:$0xff]   ;;  %v1107_v5 = vld [vmem:[#allocation5 + $0xc] ss:$16 sps:$4 sm:$0xff]  }
  0x4d   :  { %165 = vmatpush1.bf16.msra.mxu0 %v1100_v2  ;;  %v1103_v4 = vld [vmem:[#allocation5 + $0x20] ss:$16 sps:$4 sm:$0xff]   ;;  %v1105_v7 = vld [vmem:[#allocation5 + $0x8] ss:$16 sps:$4 sm:$0xff]   ;;  %vm160_vm0 = vcmask 261120   ;;  %s1352_s10 = smov [#allocation10]  }
  0x4e   :  { %166 = vmatprep.subr.bf16.mxu0 %v1101_v3  ;;  %v1111_v8 = vld [vmem:[#allocation7 + $0x4] ss:$8 sps:$4 sm:$0xff]   ;;  %v1113_v9 = vld [vmem:[#allocation7] ss:$8 sps:$4 sm:$0xff]   ;;  %v1114_v11 = vld [vmem:[#allocation7 + $0x14] ss:$8 sps:$4 sm:$0xff]  }
  0x4f   :  { %v1110_v10 = vld [vmem:[#allocation5 + $0x2c] ss:$16 sps:$4 sm:$0xff]   ;;  %658 = vmatprep.subr.bf16.mxu1 %v1111_v8  ;;  %v1116_v12 = vld [vmem:[#allocation7 + $0x10] ss:$8 sps:$4 sm:$0xff]   ;;  %v1119_v16 = vld [vmem:[#allocation7 + $0x100] ss:$8 sps:$4 sm:$0xff]  }
  0x50   :  { %659 = vmatpush1.bf16.msra.mxu1 %v1113_v9  ;;  %v1108_v13 = vld [vmem:[#allocation5 + $0x28] ss:$16 sps:$4 sm:$0xff]   ;;  %v1117_v14 = vld [vmem:[#allocation7 + $0x24] ss:$8 sps:$4 sm:$0xff]   ;;  %v1123_v18 = vld [vmem:[#allocation7 + $0x34] ss:$8 sps:$4 sm:$0xff]  }
  0x51   :  { %167 = vmatpush1.bf16.msra.mxu0 %v1103_v4  ;;  %660 = vmatprep.subr.bf16.mxu1 %v1114_v11  ;;  %v1121_v15 = vld [vmem:[#allocation7 + $0x104] ss:$8 sps:$4 sm:$0xff]   ;;  %v1122_v17 = vld [vmem:[#allocation7 + $0x20] ss:$8 sps:$4 sm:$0xff]   ;;  %v1127_v19 = vld [vmem:[#allocation7 + $0x114] ss:$8 sps:$4 sm:$0xff]   ;;  %v95_v11 = vlaneseq }
  0x52   :  { %207 = vmatprep.subr.bf16.mxu0 %v1107_v5  ;;  %v1128_v20 = vld [vmem:[#allocation7 + $0x30] ss:$8 sps:$4 sm:$0xff]   ;;  %v1129_v22 = vld [vmem:[#allocation7 + $0x44] ss:$8 sps:$4 sm:$0xff]   ;;  %v1131_v24 = vld [vmem:[#allocation7 + $0x120] ss:$8 sps:$4 sm:$0xff]  }
  0x53   :  { %v1125_v21 = vld [vmem:[#allocation7 + $0x110] ss:$8 sps:$4 sm:$0xff]   ;;  %v1133_v23 = vld [vmem:[#allocation7 + $0x124] ss:$8 sps:$4 sm:$0xff]   ;;  %v1134_v25 = vld [vmem:[#allocation7 + $0x40] ss:$8 sps:$4 sm:$0xff]  }
  0x54   :  { %964 = vmatmul.mubr.msk.bf16.vlgmr.msra.gmra.mrb[0].mxu0 %vm160_vm0, %v1104_v6  ;;  %661 = vmatpush1.bf16.msra.mxu1 %v1116_v12  ;;  %v1135_v26 = vld [vmem:[#allocation7 + $0x54] ss:$8 sps:$4 sm:$0xff]   ;;  %v1140_v28 = vld [vmem:[#allocation7 + $0x50] ss:$8 sps:$4 sm:$0xff]   ;;  %v1141_v30 = vld [vmem:[#allocation7 + $0x64] ss:$8 sps:$4 sm:$0xff]  }
  0x55   :  { %208 = vmatpush1.bf16.msra.mxu0 %v1105_v7  ;;  %239 = vmatprep.mubr.bf16.mxu0 %v1351_v0  ;;  %v1139_v27 = vld [vmem:[#allocation7 + $0x134] ss:$8 sps:$4 sm:$0xff]   ;;  %v1137_v29 = vld [vmem:[#allocation7 + $0x130] ss:$8 sps:$4 sm:$0xff]   ;;  %v1145_v31 = vld [vmem:[#allocation7 + $0x144] ss:$8 sps:$4 sm:$0xff]  }
  0x56   :  { %209 = vmatprep.subr.bf16.mxu0 %v1110_v10  ;;  %662 = vmatprep.subr.bf16.mxu1 %v1117_v14  ;;  %v1143_v32 = vld [vmem:[#allocation7 + $0x140] ss:$8 sps:$4 sm:$0xff]   ;;  %v1147_v34 = vld [vmem:[#allocation7 + $0x74] ss:$8 sps:$4 sm:$0xff]   ;;  %v1152_v36 = vld [vmem:[#allocation7 + $0x70] ss:$8 sps:$4 sm:$0xff]  }
  0x57   :  { %v1146_v33 = vld [vmem:[#allocation7 + $0x60] ss:$8 sps:$4 sm:$0xff]   ;;  %v1151_v35 = vld [vmem:[#allocation7 + $0x154] ss:$8 sps:$4 sm:$0xff]   ;;  %v1149_v37 = vld [vmem:[#allocation7 + $0x150] ss:$8 sps:$4 sm:$0xff]  }
  0x58   :  { %663 = vmatpush1.bf16.msra.mxu1 %v1122_v17  ;;  %v1153_v38 = vld [vmem:[#allocation7 + $0x84] ss:$8 sps:$4 sm:$0xff]   ;;  %v1155_v40 = vld [vmem:[#allocation7 + $0x160] ss:$8 sps:$4 sm:$0xff]   ;;  %v1159_v42 = vld [vmem:[#allocation7 + $0x94] ss:$8 sps:$4 sm:$0xff]  }
  0x59   :  { %210 = vmatpush1.bf16.msra.mxu0 %v1108_v13  ;;  %664 = vmatprep.subr.bf16.mxu1 %v1123_v18  ;;  %v1157_v39 = vld [vmem:[#allocation7 + $0x164] ss:$8 sps:$4 sm:$0xff]   ;;  %v1158_v41 = vld [vmem:[#allocation7 + $0x80] ss:$8 sps:$4 sm:$0xff]   ;;  %v1163_v43 = vld [vmem:[#allocation7 + $0x174] ss:$8 sps:$4 sm:$0xff]  }
  0x5a   :  { %701 = vmatprep.subr.bf16.mxu0 %v1121_v15  ;;  %v1164_v44 = vld [vmem:[#allocation7 + $0x90] ss:$8 sps:$4 sm:$0xff]   ;;  %v1165_v46 = vld [vmem:[#allocation7 + $0xa4] ss:$8 sps:$4 sm:$0xff]   ;;  %v1170_v48 = vld [vmem:[#allocation7 + $0xa0] ss:$8 sps:$4 sm:$0xff]  }
  0x5b   :  { %v1161_v45 = vld [vmem:[#allocation7 + $0x170] ss:$8 sps:$4 sm:$0xff]   ;;  %v1169_v47 = vld [vmem:[#allocation7 + $0x184] ss:$8 sps:$4 sm:$0xff]   ;;  %v1167_v49 = vld [vmem:[#allocation7 + $0x180] ss:$8 sps:$4 sm:$0xff]  }
  0x5c   :  { %965 = vmatmul.mubr.msk.bf16.vlgmr.msra.gmra.mrb[4].mxu0 %vm160_vm0, %v1104_v6  ;;  %665 = vmatpush1.bf16.msra.mxu1 %v1128_v20  ;;  %v1171_v50 = vld [vmem:[#allocation7 + $0xb4] ss:$8 sps:$4 sm:$0xff]   ;;  %v1176_v52 = vld [vmem:[#allocation7 + $0xb0] ss:$8 sps:$4 sm:$0xff]   ;;  %v1177_v54 = vld [vmem:[#allocation7 + $0xc4] ss:$8 sps:$4 sm:$0xff]  }
  0x5d   :  { %702 = vmatpush1.bf16.msra.mxu0 %v1119_v16  ;;  %666 = vmatprep.subr.bf16.mxu1 %v1129_v22  ;;  %v1175_v51 = vld [vmem:[#allocation7 + $0x194] ss:$8 sps:$4 sm:$0xff]   ;;  %v1173_v53 = vld [vmem:[#allocation7 + $0x190] ss:$8 sps:$4 sm:$0xff]   ;;  %v1181_v55 = vld [vmem:[#allocation7 + $0x1a4] ss:$8 sps:$4 sm:$0xff]  }
  0x5e   :  { %703 = vmatprep.subr.bf16.mxu0 %v1127_v19  ;;  %v1182_v56 = vld [vmem:[#allocation7 + $0xc0] ss:$8 sps:$4 sm:$0xff]   ;;  %v1183_v58 = vld [vmem:[#allocation7 + $0xd4] ss:$8 sps:$4 sm:$0xff]   ;;  %v1185_v60 = vld [vmem:[#allocation7 + $0x1b0] ss:$8 sps:$4 sm:$0xff]  }
  0x5f   :  { %v1179_v57 = vld [vmem:[#allocation7 + $0x1a0] ss:$8 sps:$4 sm:$0xff]   ;;  %v1187_v59 = vld [vmem:[#allocation7 + $0x1b4] ss:$8 sps:$4 sm:$0xff]   ;;  %v1188_v61 = vld [vmem:[#allocation7 + $0xd0] ss:$8 sps:$4 sm:$0xff]  }
  0x60   :  { %667 = vmatpush1.bf16.msra.mxu1 %v1134_v25  ;;  %v1189_v62 = vld [vmem:[#allocation7 + $0xe4] ss:$8 sps:$4 sm:$0xff]   ;;  %v1191_v0 = vld [vmem:[#allocation7 + $0x1c0] ss:$8 sps:$4 sm:$0xff]   ;;  %v1195_v2 = vld [vmem:[#allocation7 + $0xf4] ss:$8 sps:$4 sm:$0xff]  }
  0x61   :  { %704 = vmatpush1.bf16.msra.mxu0 %v1125_v21  ;;  %668 = vmatprep.subr.bf16.mxu1 %v1135_v26  ;;  %v1193_v63 = vld [vmem:[#allocation7 + $0x1c4] ss:$8 sps:$4 sm:$0xff]   ;;  %v1194_v1 = vld [vmem:[#allocation7 + $0xe0] ss:$8 sps:$4 sm:$0xff]   ;;  %v1199_v3 = vld [vmem:[#allocation7 + $0x1d4] ss:$8 sps:$4 sm:$0xff]  }
  0x62   :  { %705 = vmatprep.subr.bf16.mxu0 %v1133_v23  ;;  %v1197_v4 = vld [vmem:[#allocation7 + $0x1d0] ss:$8 sps:$4 sm:$0xff]   ;;  %v1203_v6 = vld [vmem:[#allocation7 + $0x1e4] ss:$8 sps:$4 sm:$0xff]   ;;  %v1201_v7 = vld [vmem:[#allocation7 + $0x1e0] ss:$8 sps:$4 sm:$0xff]  }
  0x63   :  { %v1200_v5 = vld [vmem:[#allocation7 + $0xf0] ss:$8 sps:$4 sm:$0xff]   ;;  %v1206_v8 = vld [vmem:[#allocation7 + $0x1f4] ss:$8 sps:$4 sm:$0xff]   ;;  %v1207_v10 = vld [vmem:[#allocation8 + $0x40] sm:$0xff]   ;;  %v1449_v12 = vshrl.u32 %v95_v11, 7 }
  0x64   :  { %669 = vmatpush1.bf16.msra.mxu1 %v1140_v28  ;;  %v1204_v9 = vld [vmem:[#allocation7 + $0x1f0] ss:$8 sps:$4 sm:$0xff]   ;;  %s941_s11 = sshll.u32 %s1352_s10, 4  ;;  %s942_s11 = int_to_ptr.vmem [resolvable:$true] %s941_s11 }
  0x65   :  { %706 = vmatpush1.bf16.msra.mxu0 %v1131_v24  ;;  %670 = vmatprep.subr.bf16.mxu1 %v1141_v30  ;;  %v97_v13 = vsub.s32 0, %v1449_v12  ;;  %v93_v14 = vld [vmem:[%s1489_s2] sm:$0xf]  ;;  %v101_v15 = vsub.s32 1, %v1449_v12  ;;  %v105_v21 = vsub.s32 2, %v1449_v12  ;;  %v109_v24 = vsub.s32 3, %v1449_v12  ;;  %p1316_p5 = scmp.lt.s32.totalorder %s942_s11, %s942_s11 }
  0x66   :  { %707 = vmatprep.subr.bf16.mxu0 %v1139_v27  ;;  %s1311_s12 = scalar_lea.vmem %s942_s11, 128 }
  0x67   :  { %v98_v16 = vrot.slane %v93_v14, %v97_v13  ;;  %v102_v17 = vrot.slane %v93_v14, %v101_v15  ;;  %v106_v30 = vrot.slane %v93_v14, %v105_v21  ;;  %p1312_p4 = scmp.ne.s32.totalorder %s942_s11, %s1311_s12  ;;  %p1317_p6 = scmp.lt.s32.totalorder %s1311_s12, %s1311_s12 }
  0x68   :  { %671 = vmatpush1.bf16.msra.mxu1 %v1146_v33  ;;  %v110_v33 = vrot.slane %v93_v14, %v109_v24 }
  0x69   :  { %708 = vmatpush1.bf16.msra.mxu0 %v1137_v29  ;;  %672 = vmatprep.subr.bf16.mxu1 %v1147_v34  ;;  %p1318_p7 = por %p1317_p6, %p1316_p5 }
  0x6a   :  { %709 = vmatprep.subr.bf16.mxu0 %v1145_v31 }
  0x6b   :  { %p1319_p8 = pnand %p1318_p7, %p1312_p4 }
  0x6c   :  { %673 = vmatpush1.bf16.msra.mxu1 %v1152_v36 }
  0x6d   :  { %710 = vmatpush1.bf16.msra.mxu0 %v1143_v32  ;;  %674 = vmatprep.subr.bf16.mxu1 %v1153_v38 }
  0x6e   :  { %711 = vmatprep.subr.bf16.mxu0 %v1151_v35 }
  0x70   :  { %675 = vmatpush1.bf16.msra.mxu1 %v1158_v41 }
  0x71   :  { %712 = vmatpush1.bf16.msra.mxu0 %v1149_v37  ;;  %676 = vmatprep.subr.bf16.mxu1 %v1159_v42  ;;  %v1208_v37 = vld [vmem:[#allocation8] sm:$0xff]  }
  0x72   :  { %713 = vmatprep.subr.bf16.mxu0 %v1157_v39 }
  0x74   :  { %677 = vmatpush1.bf16.msra.mxu1 %v1164_v44 }
  0x75   :  { %714 = vmatpush1.bf16.msra.mxu0 %v1155_v40  ;;  %678 = vmatprep.subr.bf16.mxu1 %v1165_v46  ;;  %v1209_v40 = vld [vmem:[#allocation8 + $0x48] sm:$0xff]  }
  0x76   :  { %715 = vmatprep.subr.bf16.mxu0 %v1163_v43  ;;  %v1210_v46 = vld [vmem:[#allocation8 + $0x8] sm:$0xff]  }
  0x78   :  { %679 = vmatpush1.bf16.msra.mxu1 %v1170_v48 }
  0x79   :  { %716 = vmatpush1.bf16.msra.mxu0 %v1161_v45  ;;  %680 = vmatprep.subr.bf16.mxu1 %v1171_v50 }
  0x7a   :  { %717 = vmatprep.subr.bf16.mxu0 %v1169_v47 }
  0x7c   :  { %681 = vmatpush1.bf16.msra.mxu1 %v1176_v52 }
  0x7d   :  { %718 = vmatpush1.bf16.msra.mxu0 %v1167_v49  ;;  %682 = vmatprep.subr.bf16.mxu1 %v1177_v54  ;;  %v1211_v49 = vld [vmem:[#allocation8 + $0x50] sm:$0xff]  }
  0x7e   :  { %719 = vmatprep.subr.bf16.mxu0 %v1175_v51  ;;  %v1212_v54 = vld [vmem:[#allocation8 + $0x10] sm:$0xff]  }
  0x80   :  { %683 = vmatpush1.bf16.msra.mxu1 %v1182_v56  ;;  %v1214_v56 = vld [vmem:[#allocation8 + $0x18] sm:$0xff]  }
  0x81   :  { %720 = vmatpush1.bf16.msra.mxu0 %v1173_v53  ;;  %684 = vmatprep.subr.bf16.mxu1 %v1183_v58  ;;  %v1216_v58 = vld [vmem:[#allocation8 + $0x20] sm:$0xff]  }
  0x82   :  { %721 = vmatprep.subr.bf16.mxu0 %v1181_v55  ;;  %v1213_v55 = vld [vmem:[#allocation8 + $0x58] sm:$0xff]  }
  0x84   :  { %685 = vmatpush1.bf16.msra.mxu1 %v1188_v61  ;;  %v1219_v61 = vld [vmem:[#allocation8 + $0x70] sm:$0xff]  }
  0x85   :  { %722 = vmatpush1.bf16.msra.mxu0 %v1179_v57  ;;  %686 = vmatprep.subr.bf16.mxu1 %v1189_v62  ;;  %v1215_v57 = vld [vmem:[#allocation8 + $0x60] sm:$0xff]   ;;  %v1220_v62 = vld [vmem:[#allocation8 + $0x30] sm:$0xff]  }
  0x86   :  { %723 = vmatprep.subr.bf16.mxu0 %v1187_v59  ;;  %v1217_v59 = vld [vmem:[#allocation8 + $0x68] sm:$0xff]  }
  0x88   :  { %687 = vmatpush1.bf16.msra.mxu1 %v1194_v1  ;;  %v326_v1 = vld [vmem:[%s1491_s4] sm:$0x3] }
  0x89   :  { %724 = vmatpush1.bf16.msra.mxu0 %v1185_v60  ;;  %688 = vmatprep.subr.bf16.mxu1 %v1195_v2  ;;  %v1218_v60 = vld [vmem:[#allocation8 + $0x28] sm:$0xff]  }
  0x8a   :  { %725 = vmatprep.subr.bf16.mxu0 %v1193_v63  ;;  %v1221_v63 = vld [vmem:[#allocation8 + $0x78] sm:$0xff]  }
  0x8c   :  { %689 = vmatpush1.bf16.msra.mxu1 %v1200_v5  ;;  %v331_v5 = vrot.slane %v326_v1, %v97_v13 }
  0x8d   :  { %726 = vmatpush1.bf16.msra.mxu0 %v1191_v0  ;;  %1056 = vmatprep.subr.bf16.mxu1 %v1207_v10  ;;  %v1222_v0 = vld [vmem:[#allocation8 + $0x38] sm:$0xff]  }
  0x8e   :  { %727 = vmatprep.subr.bf16.mxu0 %v1199_v3 }
  0x91   :  { %728 = vmatpush1.bf16.msra.mxu0 %v1197_v4 }
  0x92   :  { %729 = vmatprep.subr.bf16.mxu0 %v1203_v6 }
  0x95   :  { %730 = vmatpush1.bf16.msra.mxu0 %v1201_v7  ;;  %v335_v7 = vrot.slane %v326_v1, %v101_v15 }
  0x96   :  { %731 = vmatprep.subr.bf16.mxu0 %v1206_v8 }
  0x99   :  { %732 = vmatpush1.bf16.msra.mxu0 %v1204_v9 }
 0x127   :  { %v198_v18 = vpop.f32.mrb[0].mxu0 }
 0x128   :  { %v199_v19 = vadd.f32 %v198_v18, %v98_v16  ;;  %v200_v20 = vpop.f32.mrb[1].mxu0 }
 0x129   :  { %v201_v22 = vadd.f32 %v200_v20, %v102_v17  ;;  %v202_v23 = vpop.f32.mrb[2].mxu0 }
 0x12a   :  { %v203_v25 = vadd.f32 %v202_v23, %v98_v16  ;;  %v204_v26 = vpop.f32.mrb[3].mxu0  ;;  %v250_v28 = vmax.f32 %v199_v19, 0.0 }
 0x12b   :  { %v205_v27 = vadd.f32 %v204_v26, %v102_v17  ;;  %v251_v31 = vmax.f32 %v201_v22, 0.0 }
 0x12c   :  { %v254_v29 = vmax.f32 %v203_v25, 0.0 }
 0x12d   :  { %v255_v32 = vmax.f32 %v205_v27, 0.0 }
 0x12e   :  { %v258_v34 = vpack.c.bf16 %v254_v29, %v250_v28 }
 0x12f   :  { %v241_v35 = vpop.f32.mrb[4].mxu0  ;;  %v259_v36 = vpack.c.bf16 %v255_v32, %v251_v31 }
 0x130   :  { %v242_v38 = vadd.f32 %v241_v35, %v106_v30  ;;  %v243_v39 = vpop.f32.mrb[5].mxu0 }
 0x131   :  { %v244_v41 = vadd.f32 %v243_v39, %v110_v33  ;;  %v245_v42 = vpop.f32.mrb[6].mxu0  ;;  %690 = vmatprep.mubr.bf16.mxu1 %v259_v36 }
 0x132   :  { %v246_v43 = vadd.f32 %v245_v42, %v106_v30  ;;  %v247_v44 = vpop.f32.mrb[7].mxu0  ;;  %691 = vmatmul.mubr.bf16.vlgmr.msra.gmra.mrb[0].mxu1 %v258_v34  ;;  %v252_v47 = vmax.f32 %v242_v38, 0.0  ;;  %v1030_v30 = vld [vmem:[%s1493_s6] ss:$0 sm:$0xff] }
 0x133   :  { %v248_v45 = vadd.f32 %v247_v44, %v110_v33  ;;  %1057 = vmatpush3.bf16.msra.mxu1 %v1208_v37  ;;  %v253_v50 = vmax.f32 %v244_v41, 0.0 }
 0x134   :  { %v256_v48 = vmax.f32 %v246_v43, 0.0  ;;  %1058 = vmatprep.subr.bf16.mxu1 %v1209_v40 }
 0x135   :  { %v257_v51 = vmax.f32 %v248_v45, 0.0 }
 0x136   :  { %v260_v52 = vpack.c.bf16 %v256_v48, %v252_v47 }
 0x137   :  { %v261_v53 = vpack.c.bf16 %v257_v51, %v253_v50  ;;  %1059 = vmatpush3.bf16.msra.mxu1 %v1210_v46 }
 0x138   :  { %1060 = vmatprep.subr.bf16.mxu1 %v1211_v49 }
 0x139   :  { %733 = vmatprep.mubr.bf16.mxu0 %v261_v53 }
 0x13a   :  { %734 = vmatmul.mubr.bf16.vlgmr.msra.gmra.mrb[8].mxu0 %v260_v52 }
 0x13b   :  { %1061 = vmatpush3.bf16.msra.mxu1 %v1212_v54 }
 0x13c   :  { %1062 = vmatprep.subr.bf16.mxu1 %v1213_v55 }
 0x13f   :  { %1063 = vmatpush3.bf16.msra.mxu1 %v1214_v56 }
 0x140   :  { %1064 = vmatprep.subr.bf16.mxu1 %v1215_v57 }
 0x143   :  { %1065 = vmatpush3.bf16.msra.mxu1 %v1216_v58 }
 0x144   :  { %1066 = vmatprep.subr.bf16.mxu1 %v1217_v59 }
 0x147   :  { %1067 = vmatpush3.bf16.msra.mxu1 %v1218_v60 }
 0x148   :  { %1068 = vmatprep.subr.bf16.mxu1 %v1219_v61 }
 0x14b   :  { %1069 = vmatpush3.bf16.msra.mxu1 %v1220_v62 }
 0x14c   :  { %1070 = vmatprep.subr.bf16.mxu1 %v1221_v63 }
 0x14f   :  { %1071 = vmatpush3.bf16.msra.mxu1 %v1222_v0 }
 0x205   :  { %v692_v2 = vpop.f32.mrb[0].mxu1 }
 0x206   :  { %v694_v3 = vpop.f32.mrb[1].mxu1  ;;  %v693_v8 = vadd.f32 %v692_v2, %v331_v5 }
 0x207   :  { %v696_v4 = vpop.f32.mrb[2].mxu1  ;;  %v695_v9 = vadd.f32 %v694_v3, %v335_v7 }
 0x208   :  { %v698_v6 = vpop.f32.mrb[3].mxu1  ;;  %v697_v11 = vadd.f32 %v696_v4, %v331_v5 }
 0x209   :  { %v699_v17 = vadd.f32 %v698_v6, %v335_v7 }
 0x20d   :  { %v735_v10 = vpop.f32.mrb[8].mxu0 }
 0x20e   :  { %v736_v14 = vadd.f32 %v735_v10, %v693_v8  ;;  %v737_v16 = vpop.f32.mrb[9].mxu0 }
 0x20f   :  { %v738_v18 = vadd.f32 %v737_v16, %v695_v9  ;;  %v739_v19 = vpop.f32.mrb[10].mxu0 }
 0x210   :  { %v740_v20 = vadd.f32 %v739_v19, %v697_v11  ;;  %v741_v21 = vpop.f32.mrb[11].mxu0  ;;  %v744_v23 = vmax.f32 %v736_v14, 0.0 }
 0x211   :  { %v742_v22 = vadd.f32 %v741_v21, %v699_v17  ;;  %v745_v25 = vmax.f32 %v738_v18, 0.0 }
 0x212   :  { %v746_v24 = vmax.f32 %v740_v20, 0.0 }
 0x213   :  { %v747_v13 = vmax.f32 %v742_v22, 0.0 }
 0x214   :  { %v748_v26 = vpack.c.bf16 %v746_v24, %v744_v23 }
 0x215   :  { %v749_v27 = vpack.c.bf16 %v747_v13, %v745_v25 }
 0x217   :  { %917 = vmatprep.mubr.bf16.mxu1 %v749_v27 }
 0x218   :  { %918 = vmatmul.mubr.bf16.vlgmr.msra.gmra.mrb[4].mxu1 %v748_v26 }
 0x2eb   :  { %v1072_v12 = vpop.f32.mrb[4].mxu1 }
 0x2ec   :  { %v1073_v15 = vpop.f32.mrb[5].mxu1 }
 0x2ed   :  { %v1074_v28 = vadd.f32 %v1073_v15, %v1072_v12  ;;  %v1075_v29 = vpop.f32.mrb[6].mxu1 }
 0x2ee   :  { %v1076_v31 = vpop.f32.mrb[7].mxu1 }
 0x2ef   :  { %v1077_v32 = vadd.f32 %v1076_v31, %v1075_v29  ;;  %v920_v33 = vadd.f32 %v1074_v28, %v1030_v30 }
 0x2f1   :  { %v923_v34 = vadd.f32 %v1077_v32, %v1030_v30 }
 0x2f3   :  { %v1054_v35 = vpack.c.bf16 %v923_v34, %v920_v33 }
 0x2f5   :  { %1055 = vst [vmem:[#allocation10] sm:$0xff] %v1054_v35  }
 0x2f6   :  { %1322 = shalt.err (!%p1319_p8)
}
 0x2f7   :  { %s1323_s6 = scalar_lea.hbm %s1494_s7, 128 }
 0x2f8   :  { %p1324_p9 = scmp.ne.s32.totalorder %s1494_s7, %s1323_s6  ;;  %p1327_p10 = scmp.lt.u32.totalorder %s1323_s6, %s1494_s7 }
 0x2fa   :  { %p1329_p11 = pnand %p1327_p10, %p1324_p9 }
 0x2fc   :  { %1332 = shalt.err (!%p1329_p11)
}
 0x2fd   :  { %947 = dma.vmem_to_hbm [thread:$0]  %s942_s11, 128, %s1494_s7, [#allocation4], %s1345_s1, %s1345_s1, %s1346_s25  }
 0x2fe   :  { %1339 = dma.done.wait [#allocation4], 128  }
 0x2ff   :  { %1340 = vsyncadd [#allocation4], 4294967168 }
 0x300   :  { %951 = vsyncpa [#allocation3], 1 }
 0x301   :  { %952 = vsyncpa [#allocation6], 1 }
 0x302   :  { %953 = vsyncpa [#allocation9], 1 }
 0x303   :  { %954 = vsyncpa [#allocation4], 1 }

</bundles_post_ra>
